<compile_context>
chip_gen: v5e
topology: v5e:2x2
jax: 0.10.0
libtpu: 0.0.40
codegen_flags: <defaults>
</compile_context>

<pallas_src>
import functools

import jax
import jax.numpy as jnp
from jax.experimental import pallas as pl
from jax.experimental.pallas import tpu as pltpu

LN_EPS = 1e-5        # torch.nn.LayerNorm default
QUAL_LANES = 128     # lane-dense quality output width (sliced to 1 outside the kernel)
_ALIGN = 128         # lane alignment for packed 1-D parameters / padded feature dims


def _round_up(x, m):
    return (x + m - 1) // m * m


# ----------------------------------------------------------------------------
# Kernel
# ----------------------------------------------------------------------------
def _reconstructor_kernel(*args, two_inputs, H, H2):
    if two_inputs:
        (xa_ref, xb_ref, w1a_ref, w1b_ref, w2_ref, w3_ref,
         qw1_ref, p_ref, rec_ref, qual_ref) = args
    else:
        (xa_ref, w1a_ref, w2_ref, w3_ref,
         qw1_ref, p_ref, rec_ref, qual_ref) = args
        xb_ref = w1b_ref = None

    H_pad = w1a_ref.shape[1]
    H2_pad = w2_ref.shape[1]
    E_pad = w3_ref.shape[1]
    H4_pad = qw1_ref.shape[1]

    # Packed 1-D params: aligned static slices straight off the ref (no full-row load).
    off = 0

    def take(n):
        nonlocal off
        v = p_ref[:, off:off + n]
        off += _round_up(n, _ALIGN)
        return v

    b1, g1, be1 = take(H_pad), take(H_pad), take(H_pad)
    b2, g2, be2 = take(H2_pad), take(H2_pad), take(H2_pad)
    b3 = take(E_pad)
    qb1, qw2_row, qb2 = take(H4_pad), take(H4_pad), take(1)

    def layernorm(h, n, g, be):
        # One-pass statistics. Padded tail columns are exactly zero (zero-padded
        # weights/biases), so sums over the padded width equal sums over the real
        # width; divide by the real dim n. Padded gamma/beta are zero, so padded
        # columns stay exactly zero after LN.
        s1 = jnp.sum(h, axis=-1, keepdims=True)
        s2 = jnp.sum(h * h, axis=-1, keepdims=True)
        mu = s1 / n
        var = jnp.maximum(s2 / n - mu * mu, 0.0)
        return (h - mu) * jax.lax.rsqrt(var + LN_EPS) * g + be

    # block 1: Linear(2E->H) + LayerNorm + ReLU  (Dropout = identity, eval)
    h = jnp.dot(xa_ref[...], w1a_ref[...], preferred_element_type=jnp.float32)
    if two_inputs:
        h = h + jnp.dot(xb_ref[...], w1b_ref[...], preferred_element_type=jnp.float32)
    h = h + b1
    h = jnp.maximum(layernorm(h, H, g1, be1), 0.0)

    # block 2: Linear(H->H/2) + LayerNorm + ReLU
    h2 = jnp.dot(h.astype(jnp.bfloat16), w2_ref[...],
                 preferred_element_type=jnp.float32) + b2
    h2 = jnp.maximum(layernorm(h2, H2, g2, be2), 0.0)

    # output projection Linear(H/2->E)
    rec = jnp.dot(h2.astype(jnp.bfloat16), w3_ref[...],
                  preferred_element_type=jnp.float32) + b3
    rec_ref[...] = rec.astype(rec_ref.dtype)

    # quality head: Linear(E->H/4) -> ReLU -> VPU row-dot (H/4 -> 1) -> Sigmoid
    q = jnp.dot(rec.astype(jnp.bfloat16), qw1_ref[...],
                preferred_element_type=jnp.float32) + qb1
    q = jnp.maximum(q, 0.0)
    q = jnp.sum(q * qw2_row, axis=-1, keepdims=True) + qb2
    q = jax.nn.sigmoid(q)
    # lane-dense bf16 store (128 wide); wrapper slices back to [:, :1] f32
    qual_ref[...] = jnp.broadcast_to(q, qual_ref.shape).astype(qual_ref.dtype)


# ----------------------------------------------------------------------------
# Wrapper
# ----------------------------------------------------------------------------
def _const_spec(shape):
    """Parameter block: resident across the batch grid; single-buffered if supported."""
    index_map = lambda i: (0, 0)
    try:
        return pl.BlockSpec(shape, index_map, pipeline_mode=pl.Buffered(1))
    except Exception:  # older jax without pipeline_mode on BlockSpec
        return pl.BlockSpec(shape, index_map)


def _vmem_limit_bytes(TB, E, E_pad, H_pad, H2_pad, H4_pad, P, n_x):
    # bytes, weights single-buffered (constant index map + Buffered(1))
    weights = 2 * (n_x * E * H_pad + H_pad * H2_pad + H2_pad * E_pad + E_pad * H4_pad)
    packed = 4 * P
    io = 2 * (n_x * 2 * TB * E)                         # bf16 input tiles, double-buffered
    io += 2 * (4 * TB * E_pad + 2 * TB * QUAL_LANES)    # rec f32 + qual bf16, double-buffered
    acts = 4 * TB * (H_pad + H2_pad + E_pad + H4_pad)   # f32 intermediates
    acts += 2 * TB * (H_pad + H2_pad + E_pad)           # bf16 casts feeding the MXU
    need = weights + packed + io + acts
    limit = int(need * 1.25)
    # never below the default scoped limit, never the whole v7x VMEM (64 MiB)
    return min(max(limit, 32 * 1024 * 1024), 48 * 1024 * 1024)


def _pick_tile(B):
    """Batch tile: multiple of 16 (bf16 sublanes); >=2 grid steps for 256<B<=512 so the
    parallel batch axis can shard across v7x's two TensorCores; TB=512 for big B."""
    if B <= 256:
        return _round_up(max(B, 1), 16)
    if B <= 512:
        return 256
    return 512


def _run_reconstructor(xa, xb, branch, quality, H):
    """xa, xb: [B, E] embeddings (xb may be None) -> (reconstructed [B,E] f32, quality [B,1] f32)."""
    B, E = xa.shape
    H2 = H // 2
    H_pad = branch["w1a"].shape[1]
    H2_pad = branch["w2"].shape[1]
    E_pad = branch["w3"].shape[1]
    H4_pad = quality["w1"].shape[1]
    two = xb is not None
    n_x = 2 if two else 1

    TB = _pick_tile(B)
    B_pad = _round_up(B, TB)

    xa = xa.astype(jnp.bfloat16)
    if two:
        xb = xb.astype(jnp.bfloat16)
    if B_pad != B:
        pad = ((0, B_pad - B), (0, 0))
        xa = jnp.pad(xa, pad)
        if two:
            xb = jnp.pad(xb, pad)
    grid = (B_pad // TB,)

    row_map = lambda i: (i, 0)

    args = [xa]
    in_specs = [pl.BlockSpec((TB, E), row_map)]
    if two:
        args.append(xb)
        in_specs.append(pl.BlockSpec((TB, E), row_map))
    args.append(branch["w1a"])
    in_specs.append(_const_spec(branch["w1a"].shape))
    if two:
        args.append(branch["w1b"])
        in_specs.append(_const_spec(branch["w1b"].shape))
    args += [branch["w2"], branch["w3"], quality["w1"], branch["packed"]]
    in_specs += [_const_spec(branch["w2"].shape),
                 _const_spec(branch["w3"].shape),
                 _const_spec(quality["w1"].shape),
                 _const_spec(branch["packed"].shape)]

    out_specs = (
        pl.BlockSpec((TB, E_pad), row_map),
        pl.BlockSpec((TB, QUAL_LANES), row_map),
    )
    out_shape = (
        jax.ShapeDtypeStruct((B_pad, E_pad), jnp.float32),
        jax.ShapeDtypeStruct((B_pad, QUAL_LANES), jnp.bfloat16),
    )

    rec, qual = pl.pallas_call(
        functools.partial(_reconstructor_kernel, two_inputs=two, H=H, H2=H2),
        grid=grid,
        in_specs=in_specs,
        out_specs=out_specs,
        out_shape=out_shape,
        compiler_params=pltpu.CompilerParams(
            dimension_semantics=("parallel",),
            vmem_limit_bytes=_vmem_limit_bytes(
                TB, E, E_pad, H_pad, H2_pad, H4_pad,
                branch["packed"].shape[1], n_x),
        ),
    )(*args)
    return rec[:B, :E], qual[:B, :1].astype(jnp.float32)


# ----------------------------------------------------------------------------
# Parameter init / model class
# ----------------------------------------------------------------------------
def _init_linear(key, fan_in, fan_out, pad_in=None, pad_out=None, w_dtype=jnp.bfloat16):
    """Kaiming-uniform-like init (torch.nn.Linear ranges); weights stored [in, out],
    zero-padded to lane-aligned (pad_in, pad_out)."""
    pad_in = fan_in if pad_in is None else pad_in
    pad_out = fan_out if pad_out is None else pad_out
    kw, kb = jax.random.split(key)
    bound = 1.0 / jnp.sqrt(fan_in)
    w = jax.random.uniform(kw, (fan_in, fan_out), jnp.float32, -bound, bound)
    b = jax.random.uniform(kb, (1, fan_out), jnp.float32, -bound, bound)
    w = jnp.pad(w, ((0, pad_in - fan_in), (0, pad_out - fan_out)))
    b = jnp.pad(b, ((0, 0), (0, pad_out - fan_out)))
    return w.astype(w_dtype), b


def _ones_padded(n, n_pad):
    return jnp.pad(jnp.ones((1, n), jnp.float32), ((0, 0), (0, n_pad - n)))


def _init_branch(key, E, H):
    H2 = H // 2
    E_pad = _round_up(E, _ALIGN)
    H_pad = _round_up(H, _ALIGN)
    H2_pad = _round_up(H2, _ALIGN)
    k1, k2, k3 = jax.random.split(key, 3)
    w1, b1 = _init_linear(k1, 2 * E, H, pad_out=H_pad)            # [2E, H_pad]
    w2, b2 = _init_linear(k2, H, H2, pad_in=H_pad, pad_out=H2_pad)
    w3, b3 = _init_linear(k3, H2, E, pad_in=H2_pad, pad_out=E_pad)
    return {
        "w1a": w1[:E], "w1b": w1[E:], "b1": b1,
        "g1": _ones_padded(H, H_pad), "be1": jnp.zeros((1, H_pad), jnp.float32),
        "w2": w2, "b2": b2,
        "g2": _ones_padded(H2, H2_pad), "be2": jnp.zeros((1, H2_pad), jnp.float32),
        "w3": w3, "b3": b3,
    }


def _pack_aligned(parts):
    """Concat [1, n] rows, each padded to a 128-lane boundary (matches kernel `take`)."""
    segs = []
    for p_ in parts:
        n = p_.shape[1]
        segs.append(jnp.pad(p_, ((0, 0), (0, _round_up(n, _ALIGN) - n))))
    return jnp.concatenate(segs, axis=1)


class ModalityReconstructorPallas:
    """JAX/Pallas port of ModalityReconstructor (eval mode: dropout = identity)."""

    def __init__(self, embedding_dim: int, hidden_dim: int = 512, seed: int = 0):
        self.embedding_dim = embedding_dim
        self.hidden_dim = hidden_dim
        E, H = embedding_dim, hidden_dim
        H4 = H // 4
        E_pad = _round_up(E, _ALIGN)
        H4_pad = _round_up(H4, _ALIGN)

        key = jax.random.PRNGKey(seed)
        kv, kt, kl, kq1, kq2 = jax.random.split(key, 5)
        self.visual = _init_branch(kv, E, H)
        self.text = _init_branch(kt, E, H)
        self.layout = _init_branch(kl, E, H)

        qw1, qb1 = _init_linear(kq1, E, H4, pad_in=E_pad, pad_out=H4_pad)
        qw2, qb2 = _init_linear(kq2, H4, 1, w_dtype=jnp.float32)      # [H4, 1], [1, 1]
        qw2_row = jnp.pad(qw2.reshape(1, H4), ((0, 0), (0, H4_pad - H4)))
        self.quality = {"w1": qw1, "b1": qb1, "w2_row": qw2_row, "b2": qb2}

        # Pack all 1-D params (per branch + shared quality tail) into one vector each.
        tail = [self.quality["b1"], self.quality["w2_row"], self.quality["b2"]]
        for br in (self.visual, self.text, self.layout):
            br["packed"] = _pack_aligned(
                [br["b1"], br["g1"], br["be1"], br["b2"], br["g2"], br["be2"], br["b3"]]
                + tail)

    @staticmethod
    def _ensure_tensor(embedding):
        if isinstance(embedding, (list, tuple)):
            if not embedding:
                raise ValueError("empty embedding list")
            if len(embedding) == 1:
                return embedding[0]
            return jnp.mean(jnp.concatenate(embedding, axis=0), axis=0, keepdims=True)
        return embedding

    # torch: combined = cat([a, b], dim=1); here the concat is fused into the kernel
    # by splitting w1 into two halves; a missing second operand skips its matmul
    # (identical to multiplying by zeros).
    def reconstruct_visual(self, text_embedding, layout_embedding=None):
        text_embedding = self._ensure_tensor(text_embedding)
        return _run_reconstructor(text_embedding, layout_embedding,
                                  self.visual, self.quality, self.hidden_dim)

    def reconstruct_text(self, visual_embedding, layout_embedding=None):
        return _run_reconstructor(visual_embedding, layout_embedding,
                                  self.text, self.quality, self.hidden_dim)

    def reconstruct_layout(self, visual_embedding, text_embedding):
        text_embedding = self._ensure_tensor(text_embedding)
        return _run_reconstructor(visual_embedding, text_embedding,
                                  self.layout, self.quality, self.hidden_dim)

    def __call__(self, target_modality: int, visual_embedding=None,
                 text_embedding=None, layout_embedding=None):
        results = {}
        if target_modality == 0:
            if text_embedding is None:
                raise ValueError("reconstructing visual requires text embedding")
            rec, qual = self.reconstruct_visual(text_embedding, layout_embedding)
            results["modality"] = "visual"
        elif target_modality == 1:
            if visual_embedding is None:
                raise ValueError("reconstructing text requires visual embedding")
            rec, qual = self.reconstruct_text(visual_embedding, layout_embedding)
            results["modality"] = "text"
        elif target_modality == 2:
            if visual_embedding is None or text_embedding is None:
                raise ValueError("reconstructing layout requires visual and text embeddings")
            rec, qual = self.reconstruct_layout(visual_embedding, text_embedding)
            results["modality"] = "layout"
        else:
            raise ValueError(f"invalid target modality: {target_modality}")
        results["reconstructed"] = rec
        results["quality"] = qual
        return results


# ----------------------------------------------------------------------------
# Pure-JAX reference (mirrors kernel precision: bf16 matmul inputs, f32 accumulate)
# ----------------------------------------------------------------------------
def _ref_branch(xa, xb, p, q, H):
    H2 = H // 2

    def bdot(a, w):
        return jnp.dot(a.astype(jnp.bfloat16), w, preferred_element_type=jnp.float32)

    def ln(h, n, g, be):
        s1 = h.sum(-1, keepdims=True)
        s2 = (h * h).sum(-1, keepdims=True)
        mu = s1 / n
        var = jnp.maximum(s2 / n - mu * mu, 0.0)
        return (h - mu) * jax.lax.rsqrt(var + LN_EPS) * g + be

    h = bdot(xa, p["w1a"])
    if xb is not None:
        h = h + bdot(xb, p["w1b"])
    h = jnp.maximum(ln(h + p["b1"], H, p["g1"], p["be1"]), 0.0)
    h2 = jnp.maximum(ln(bdot(h, p["w2"]) + p["b2"], H2, p["g2"], p["be2"]), 0.0)
    rec = bdot(h2, p["w3"]) + p["b3"]
    qh = jnp.maximum(bdot(rec, q["w1"]) + q["b1"], 0.0)
    qual = jax.nn.sigmoid(jnp.sum(qh * q["w2_row"], axis=-1, keepdims=True) + q["b2"])
    return rec, qual


if __name__ == "__main__":
    # small shapes: batch=8, embedding_dim=32, hidden_dim=64
    B, E, H = 8, 32, 64
    model = ModalityReconstructorPallas(embedding_dim=E, hidden_dim=H, seed=0)

    key = jax.random.PRNGKey(0)
    kv, kt, kl = jax.random.split(key, 3)
    visual_embedding = jax.random.normal(kv, (B, E), jnp.float32)
    text_embedding = jax.random.normal(kt, (B, E), jnp.float32)
    layout_embedding = jax.random.normal(kl, (B, E), jnp.float32)

    # TODO(synk): training-mode Dropout (stochastic masking) is not applied;
    # this implements the eval/inference forward where Dropout is identity.

    # target_modality = 0 : reconstruct visual from text (+ layout)
    out0 = model(0, text_embedding=text_embedding, layout_embedding=layout_embedding)
    # target_modality = 1 : reconstruct text from visual (layout missing -> matmul skipped)
    out1 = model(1, visual_embedding=visual_embedding)
    # target_modality = 2 : multi-tensor text list path (mean-reduced to batch-1 row)
    out2 = model(2, visual_embedding=visual_embedding[:1],
                 text_embedding=[text_embedding[:1], layout_embedding[:1]])

    jax.block_until_ready((out0["reconstructed"], out0["quality"],
                           out1["reconstructed"], out1["quality"],
                           out2["reconstructed"], out2["quality"]))

    # sanity checks against the pure-JAX reference
    ref_rec, ref_q = _ref_branch(text_embedding, layout_embedding,
                                 model.visual, model.quality, H)
    assert jnp.allclose(out0["reconstructed"], ref_rec[:, :E], atol=5e-3, rtol=5e-3)
    assert jnp.allclose(out0["quality"], ref_q, atol=1e-2, rtol=1e-2)

    ref_rec1, ref_q1 = _ref_branch(visual_embedding, None,
                                   model.text, model.quality, H)
    assert jnp.allclose(out1["reconstructed"], ref_rec1[:, :E], atol=5e-3, rtol=5e-3)
    assert jnp.allclose(out1["quality"], ref_q1, atol=1e-2, rtol=1e-2)

    assert out0["reconstructed"].shape == (B, E) and out0["quality"].shape == (B, 1)
    assert out1["reconstructed"].shape == (B, E) and out1["quality"].shape == (B, 1)
    assert out2["reconstructed"].shape == (1, E) and out2["quality"].shape == (1, 1)

    print("KERNEL_OK")
</pallas_src>

<mosaic_0001>
module attributes {stable_mosaic.version = 11 : i64} {
  func.func @_reconstructor_kernel(%arg0: i32, %arg1: memref<16x32xbf16, #tpu.memory_space<vmem>>, %arg2: memref<16x32xbf16, #tpu.memory_space<vmem>>, %arg3: memref<32x128xbf16, #tpu.memory_space<vmem>>, %arg4: memref<32x128xbf16, #tpu.memory_space<vmem>>, %arg5: memref<128x128xbf16, #tpu.memory_space<vmem>>, %arg6: memref<128x128xbf16, #tpu.memory_space<vmem>>, %arg7: memref<128x128xbf16, #tpu.memory_space<vmem>>, %arg8: memref<1x1280xf32, #tpu.memory_space<vmem>>, %arg9: memref<16x128xf32, #tpu.memory_space<vmem>>, %arg10: memref<16x128xbf16, #tpu.memory_space<vmem>>) attributes {dimension_semantics = [#tpu.dimension_semantics<parallel>], iteration_bounds = array<i64: 1>, scalar_prefetch = 0 : i64, scratch_operands = 0 : i64, tpu.core_type = #tpu.core_type<tc>, window_params = [{transform_indices = @transform_0, window_bounds = array<i64: 16, 32>}, {transform_indices = @transform_1, window_bounds = array<i64: 16, 32>}, {pipeline_mode = #tpu.pipeline_mode<synchronous>, transform_indices = @transform_2, window_bounds = array<i64: 32, 128>}, {pipeline_mode = #tpu.pipeline_mode<synchronous>, transform_indices = @transform_3, window_bounds = array<i64: 32, 128>}, {pipeline_mode = #tpu.pipeline_mode<synchronous>, transform_indices = @transform_4, window_bounds = array<i64: 128, 128>}, {pipeline_mode = #tpu.pipeline_mode<synchronous>, transform_indices = @transform_5, window_bounds = array<i64: 128, 128>}, {pipeline_mode = #tpu.pipeline_mode<synchronous>, transform_indices = @transform_6, window_bounds = array<i64: 128, 128>}, {pipeline_mode = #tpu.pipeline_mode<synchronous>, transform_indices = @transform_7, window_bounds = array<i64: 1, 1280>}, {transform_indices = @transform_8, window_bounds = array<i64: 16, 128>}, {transform_indices = @transform_9, window_bounds = array<i64: 16, 128>}]} {
    %c0 = arith.constant 0 : index
    %c0_0 = arith.constant 0 : index
    %0 = vector.load %arg8[%c0, %c0_0] : memref<1x1280xf32, #tpu.memory_space<vmem>>, vector<1x128xf32>
    %c0_1 = arith.constant 0 : index
    %c128 = arith.constant 128 : index
    %1 = vector.load %arg8[%c0_1, %c128] : memref<1x1280xf32, #tpu.memory_space<vmem>>, vector<1x128xf32>
    %c0_2 = arith.constant 0 : index
    %c256 = arith.constant 256 : index
    %2 = vector.load %arg8[%c0_2, %c256] : memref<1x1280xf32, #tpu.memory_space<vmem>>, vector<1x128xf32>
    %c0_3 = arith.constant 0 : index
    %c384 = arith.constant 384 : index
    %3 = vector.load %arg8[%c0_3, %c384] : memref<1x1280xf32, #tpu.memory_space<vmem>>, vector<1x128xf32>
    %c0_4 = arith.constant 0 : index
    %c512 = arith.constant 512 : index
    %4 = vector.load %arg8[%c0_4, %c512] : memref<1x1280xf32, #tpu.memory_space<vmem>>, vector<1x128xf32>
    %c0_5 = arith.constant 0 : index
    %c640 = arith.constant 640 : index
    %5 = vector.load %arg8[%c0_5, %c640] : memref<1x1280xf32, #tpu.memory_space<vmem>>, vector<1x128xf32>
    %c0_6 = arith.constant 0 : index
    %c768 = arith.constant 768 : index
    %6 = vector.load %arg8[%c0_6, %c768] : memref<1x1280xf32, #tpu.memory_space<vmem>>, vector<1x128xf32>
    %c0_7 = arith.constant 0 : index
    %c896 = arith.constant 896 : index
    %7 = vector.load %arg8[%c0_7, %c896] : memref<1x1280xf32, #tpu.memory_space<vmem>>, vector<1x128xf32>
    %c0_8 = arith.constant 0 : index
    %c1024 = arith.constant 1024 : index
    %8 = vector.load %arg8[%c0_8, %c1024] : memref<1x1280xf32, #tpu.memory_space<vmem>>, vector<1x128xf32>
    %c0_9 = arith.constant 0 : index
    %c1152 = arith.constant 1152 : index
    %9 = vector.load %arg8[%c0_9, %c1152] : memref<1x1280xf32, #tpu.memory_space<vmem>>, vector<1x1xf32>
    %c0_10 = arith.constant 0 : index
    %c0_11 = arith.constant 0 : index
    %10 = vector.load %arg1[%c0_10, %c0_11] : memref<16x32xbf16, #tpu.memory_space<vmem>>, vector<16x32xbf16>
    %c0_12 = arith.constant 0 : index
    %c0_13 = arith.constant 0 : index
    %11 = vector.load %arg3[%c0_12, %c0_13] : memref<32x128xbf16, #tpu.memory_space<vmem>>, vector<32x128xbf16>
    %cst = arith.constant dense<0.000000e+00> : vector<16x128xf32>
    %12 = tpu.matmul %10, %11, %cst {dimension_numbers = #tpu.dot_dimension_numbers<[1], [0], [0], [1], [0, 0, 1, 1], [], []>} : vector<16x32xbf16>, vector<32x128xbf16>, vector<16x128xf32> -> vector<16x128xf32>
    %c0_14 = arith.constant 0 : index
    %c0_15 = arith.constant 0 : index
    %13 = vector.load %arg2[%c0_14, %c0_15] : memref<16x32xbf16, #tpu.memory_space<vmem>>, vector<16x32xbf16>
    %c0_16 = arith.constant 0 : index
    %c0_17 = arith.constant 0 : index
    %14 = vector.load %arg4[%c0_16, %c0_17] : memref<32x128xbf16, #tpu.memory_space<vmem>>, vector<32x128xbf16>
    %cst_18 = arith.constant dense<0.000000e+00> : vector<16x128xf32>
    %15 = tpu.matmul %13, %14, %cst_18 {dimension_numbers = #tpu.dot_dimension_numbers<[1], [0], [0], [1], [0, 0, 1, 1], [], []>} : vector<16x32xbf16>, vector<32x128xbf16>, vector<16x128xf32> -> vector<16x128xf32>
    %16 = arith.addf %12, %15 : vector<16x128xf32>
    %17 = vector.broadcast %0 : vector<1x128xf32> to vector<16x128xf32>
    %18 = arith.addf %16, %17 : vector<16x128xf32>
    %cst_19 = arith.constant dense<0.000000e+00> : vector<16xf32>
    %19 = vector.multi_reduction <add>, %18, %cst_19 [1] : vector<16x128xf32> to vector<16xf32>
    %20 = vector.shape_cast %19 : vector<16xf32> to vector<16x1xf32>
    %21 = arith.mulf %18, %18 : vector<16x128xf32>
    %cst_20 = arith.constant dense<0.000000e+00> : vector<16xf32>
    %22 = vector.multi_reduction <add>, %21, %cst_20 [1] : vector<16x128xf32> to vector<16xf32>
    %23 = vector.shape_cast %22 : vector<16xf32> to vector<16x1xf32>
    %cst_21 = arith.constant 6.400000e+01 : f32
    %24 = vector.broadcast %cst_21 : f32 to vector<16x1xf32>
    %25 = arith.divf %20, %24 : vector<16x1xf32>
    %cst_22 = arith.constant 6.400000e+01 : f32
    %26 = vector.broadcast %cst_22 : f32 to vector<16x1xf32>
    %27 = arith.divf %23, %26 : vector<16x1xf32>
    %28 = arith.mulf %25, %25 : vector<16x1xf32>
    %29 = arith.subf %27, %28 : vector<16x1xf32>
    %cst_23 = arith.constant 0.000000e+00 : f32
    %30 = vector.broadcast %cst_23 : f32 to vector<16x1xf32>
    %31 = arith.maximumf %29, %30 : vector<16x1xf32>
    %32 = vector.broadcast %25 : vector<16x1xf32> to vector<16x128xf32>
    %33 = arith.subf %18, %32 : vector<16x128xf32>
    %cst_24 = arith.constant 9.99999974E-6 : f32
    %34 = vector.broadcast %cst_24 : f32 to vector<16x1xf32>
    %35 = arith.addf %31, %34 : vector<16x1xf32>
    %36 = math.rsqrt %35 : vector<16x1xf32>
    %37 = vector.broadcast %36 : vector<16x1xf32> to vector<16x128xf32>
    %38 = arith.mulf %33, %37 : vector<16x128xf32>
    %39 = vector.broadcast %1 : vector<1x128xf32> to vector<16x128xf32>
    %40 = arith.mulf %38, %39 : vector<16x128xf32>
    %41 = vector.broadcast %2 : vector<1x128xf32> to vector<16x128xf32>
    %42 = arith.addf %40, %41 : vector<16x128xf32>
    %cst_25 = arith.constant 0.000000e+00 : f32
    %43 = vector.broadcast %cst_25 : f32 to vector<16x128xf32>
    %44 = arith.maximumf %42, %43 : vector<16x128xf32>
    %45 = arith.truncf %44 : vector<16x128xf32> to vector<16x128xbf16>
    %c0_26 = arith.constant 0 : index
    %c0_27 = arith.constant 0 : index
    %46 = vector.load %arg5[%c0_26, %c0_27] : memref<128x128xbf16, #tpu.memory_space<vmem>>, vector<128x128xbf16>
    %cst_28 = arith.constant dense<0.000000e+00> : vector<16x128xf32>
    %47 = tpu.matmul %45, %46, %cst_28 {dimension_numbers = #tpu.dot_dimension_numbers<[1], [0], [0], [1], [0, 0, 1, 1], [], []>} : vector<16x128xbf16>, vector<128x128xbf16>, vector<16x128xf32> -> vector<16x128xf32>
    %48 = vector.broadcast %3 : vector<1x128xf32> to vector<16x128xf32>
    %49 = arith.addf %47, %48 : vector<16x128xf32>
    %cst_29 = arith.constant dense<0.000000e+00> : vector<16xf32>
    %50 = vector.multi_reduction <add>, %49, %cst_29 [1] : vector<16x128xf32> to vector<16xf32>
    %51 = vector.shape_cast %50 : vector<16xf32> to vector<16x1xf32>
    %52 = arith.mulf %49, %49 : vector<16x128xf32>
    %cst_30 = arith.constant dense<0.000000e+00> : vector<16xf32>
    %53 = vector.multi_reduction <add>, %52, %cst_30 [1] : vector<16x128xf32> to vector<16xf32>
    %54 = vector.shape_cast %53 : vector<16xf32> to vector<16x1xf32>
    %cst_31 = arith.constant 3.200000e+01 : f32
    %55 = vector.broadcast %cst_31 : f32 to vector<16x1xf32>
    %56 = arith.divf %51, %55 : vector<16x1xf32>
    %cst_32 = arith.constant 3.200000e+01 : f32
    %57 = vector.broadcast %cst_32 : f32 to vector<16x1xf32>
    %58 = arith.divf %54, %57 : vector<16x1xf32>
    %59 = arith.mulf %56, %56 : vector<16x1xf32>
    %60 = arith.subf %58, %59 : vector<16x1xf32>
    %cst_33 = arith.constant 0.000000e+00 : f32
    %61 = vector.broadcast %cst_33 : f32 to vector<16x1xf32>
    %62 = arith.maximumf %60, %61 : vector<16x1xf32>
    %63 = vector.broadcast %56 : vector<16x1xf32> to vector<16x128xf32>
    %64 = arith.subf %49, %63 : vector<16x128xf32>
    %cst_34 = arith.constant 9.99999974E-6 : f32
    %65 = vector.broadcast %cst_34 : f32 to vector<16x1xf32>
    %66 = arith.addf %62, %65 : vector<16x1xf32>
    %67 = math.rsqrt %66 : vector<16x1xf32>
    %68 = vector.broadcast %67 : vector<16x1xf32> to vector<16x128xf32>
    %69 = arith.mulf %64, %68 : vector<16x128xf32>
    %70 = vector.broadcast %4 : vector<1x128xf32> to vector<16x128xf32>
    %71 = arith.mulf %69, %70 : vector<16x128xf32>
    %72 = vector.broadcast %5 : vector<1x128xf32> to vector<16x128xf32>
    %73 = arith.addf %71, %72 : vector<16x128xf32>
    %cst_35 = arith.constant 0.000000e+00 : f32
    %74 = vector.broadcast %cst_35 : f32 to vector<16x128xf32>
    %75 = arith.maximumf %73, %74 : vector<16x128xf32>
    %76 = arith.truncf %75 : vector<16x128xf32> to vector<16x128xbf16>
    %c0_36 = arith.constant 0 : index
    %c0_37 = arith.constant 0 : index
    %77 = vector.load %arg6[%c0_36, %c0_37] : memref<128x128xbf16, #tpu.memory_space<vmem>>, vector<128x128xbf16>
    %cst_38 = arith.constant dense<0.000000e+00> : vector<16x128xf32>
    %78 = tpu.matmul %76, %77, %cst_38 {dimension_numbers = #tpu.dot_dimension_numbers<[1], [0], [0], [1], [0, 0, 1, 1], [], []>} : vector<16x128xbf16>, vector<128x128xbf16>, vector<16x128xf32> -> vector<16x128xf32>
    %79 = vector.broadcast %6 : vector<1x128xf32> to vector<16x128xf32>
    %80 = arith.addf %78, %79 : vector<16x128xf32>
    %c0_39 = arith.constant 0 : index
    %c0_40 = arith.constant 0 : index
    %81 = vector.load %arg9[%c0_39, %c0_40] : memref<16x128xf32, #tpu.memory_space<vmem>>, vector<16x128xf32>
    tpu.vector_store %arg9[%c0_39, %c0_40], %80 {strides = array<i32>} : memref<16x128xf32, #tpu.memory_space<vmem>>, vector<16x128xf32>,
    %82 = arith.truncf %80 : vector<16x128xf32> to vector<16x128xbf16>
    %c0_41 = arith.constant 0 : index
    %c0_42 = arith.constant 0 : index
    %83 = vector.load %arg7[%c0_41, %c0_42] : memref<128x128xbf16, #tpu.memory_space<vmem>>, vector<128x128xbf16>
    %cst_43 = arith.constant dense<0.000000e+00> : vector<16x128xf32>
    %84 = tpu.matmul %82, %83, %cst_43 {dimension_numbers = #tpu.dot_dimension_numbers<[1], [0], [0], [1], [0, 0, 1, 1], [], []>} : vector<16x128xbf16>, vector<128x128xbf16>, vector<16x128xf32> -> vector<16x128xf32>
    %85 = vector.broadcast %7 : vector<1x128xf32> to vector<16x128xf32>
    %86 = arith.addf %84, %85 : vector<16x128xf32>
    %cst_44 = arith.constant 0.000000e+00 : f32
    %87 = vector.broadcast %cst_44 : f32 to vector<16x128xf32>
    %88 = arith.maximumf %86, %87 : vector<16x128xf32>
    %89 = vector.broadcast %8 : vector<1x128xf32> to vector<16x128xf32>
    %90 = arith.mulf %88, %89 : vector<16x128xf32>
    %cst_45 = arith.constant dense<0.000000e+00> : vector<16xf32>
    %91 = vector.multi_reduction <add>, %90, %cst_45 [1] : vector<16x128xf32> to vector<16xf32>
    %92 = vector.shape_cast %91 : vector<16xf32> to vector<16x1xf32>
    %93 = vector.broadcast %9 : vector<1x1xf32> to vector<16x1xf32>
    %94 = arith.addf %92, %93 : vector<16x1xf32>
    %95 = arith.negf %94 : vector<16x1xf32>
    %96 = math.exp %95 : vector<16x1xf32>
    %cst_46 = arith.constant 1.000000e+00 : f32
    %97 = vector.broadcast %cst_46 : f32 to vector<16x1xf32>
    %98 = arith.addf %97, %96 : vector<16x1xf32>
    %99 = arith.divf %97, %98 : vector<16x1xf32>
    %100 = vector.shape_cast %99 : vector<16x1xf32> to vector<16x1xf32>
    %101 = vector.broadcast %100 : vector<16x1xf32> to vector<16x128xf32>
    %102 = arith.truncf %101 : vector<16x128xf32> to vector<16x128xbf16>
    %c0_47 = arith.constant 0 : index
    %c0_48 = arith.constant 0 : index
    %103 = vector.load %arg10[%c0_47, %c0_48] : memref<16x128xbf16, #tpu.memory_space<vmem>>, vector<16x128xbf16>
    tpu.vector_store %arg10[%c0_47, %c0_48], %102 {strides = array<i32>} : memref<16x128xbf16, #tpu.memory_space<vmem>>, vector<16x128xbf16>,
    return
  }
  func.func @transform_0(%arg0: i32) -> (i32, i32) {
    %c0_i32 = arith.constant 0 : i32
    %c0_i32_0 = arith.constant 0 : i32
    return %arg0, %c0_i32 : i32, i32
  }
  func.func @transform_1(%arg0: i32) -> (i32, i32) {
    %c0_i32 = arith.constant 0 : i32
    %c0_i32_0 = arith.constant 0 : i32
    return %arg0, %c0_i32 : i32, i32
  }
  func.func @transform_2(%arg0: i32) -> (i32, i32) {
    %c0_i32 = arith.constant 0 : i32
    %c0_i32_0 = arith.constant 0 : i32
    %c0_i32_1 = arith.constant 0 : i32
    return %c0_i32, %c0_i32_0 : i32, i32
  }
  func.func @transform_3(%arg0: i32) -> (i32, i32) {
    %c0_i32 = arith.constant 0 : i32
    %c0_i32_0 = arith.constant 0 : i32
    %c0_i32_1 = arith.constant 0 : i32
    return %c0_i32, %c0_i32_0 : i32, i32
  }
  func.func @transform_4(%arg0: i32) -> (i32, i32) {
    %c0_i32 = arith.constant 0 : i32
    %c0_i32_0 = arith.constant 0 : i32
    %c0_i32_1 = arith.constant 0 : i32
    return %c0_i32, %c0_i32_0 : i32, i32
  }
  func.func @transform_5(%arg0: i32) -> (i32, i32) {
    %c0_i32 = arith.constant 0 : i32
    %c0_i32_0 = arith.constant 0 : i32
    %c0_i32_1 = arith.constant 0 : i32
    return %c0_i32, %c0_i32_0 : i32, i32
  }
  func.func @transform_6(%arg0: i32) -> (i32, i32) {
    %c0_i32 = arith.constant 0 : i32
    %c0_i32_0 = arith.constant 0 : i32
    %c0_i32_1 = arith.constant 0 : i32
    return %c0_i32, %c0_i32_0 : i32, i32
  }
  func.func @transform_7(%arg0: i32) -> (i32, i32) {
    %c0_i32 = arith.constant 0 : i32
    %c0_i32_0 = arith.constant 0 : i32
    %c0_i32_1 = arith.constant 0 : i32
    return %c0_i32, %c0_i32_0 : i32, i32
  }
  func.func @transform_8(%arg0: i32) -> (i32, i32) {
    %c0_i32 = arith.constant 0 : i32
    %c0_i32_0 = arith.constant 0 : i32
    return %arg0, %c0_i32 : i32, i32
  }
  func.func @transform_9(%arg0: i32) -> (i32, i32) {
    %c0_i32 = arith.constant 0 : i32
    %c0_i32_0 = arith.constant 0 : i32
    return %arg0, %c0_i32 : i32, i32
  }
}

</mosaic_0001>

<bundles_post_ra>
// kernel: tpu_custom_call.1
= control target key start
LH: loop header
LB: loop body
LE: loop exit
PB: predicated region body
PF: predicated region fallthrough
CT: control target
= control target key end

     0   :  { %15 = vsyncpa [#allocation3], 0  ;;  %s1352_s0 = inlined_call_operand.hbm [shape: bf16[16,32], index: 0, kind: input, shape index: {}]   ;;  %s1353_s1 = inlined_call_operand.hbm [shape: bf16[16,32], index: 1, kind: input, shape index: {}]   ;;  %s1354_s2 = inlined_call_operand.hbm [shape: bf16[32,128], index: 2, kind: input, shape index: {}]   ;;  %s1355_s3 = inlined_call_operand.hbm [shape: bf16[32,128], index: 3, kind: input, shape index: {}]   ;;  %s1356_s4 = inlined_call_operand.hbm [shape: bf16[128,128], index: 4, kind: input, shape index: {}]   ;;  %s1357_s5 = inlined_call_operand.hbm [shape: bf16[128,128], index: 5, kind: input, shape index: {}]   ;;  %s1358_s6 = inlined_call_operand.hbm [shape: bf16[128,128], index: 6, kind: input, shape index: {}]   ;;  %s1359_s7 = inlined_call_operand.hbm [shape: f32[1,1280], index: 7, kind: input, shape index: {}]   ;;  %s1360_s8 = inlined_call_operand.hbm [shape: f32[16,128], index: 8, kind: output, shape index: {0}]   ;;  %s1361_s9 = inlined_call_operand.hbm [shape: bf16[16,128], index: 9, kind: output, shape index: {1}]  }
   0x1   :  { %16 = vsyncpa [#allocation6], 0 }
   0x2   :  { %17 = vsyncpa [#allocation9], 0 }
   0x3   :  { %18 = vsyncpa [#allocation12], 0 }
   0x4   :  { %19 = vsyncpa [#allocation15], 0 }
   0x5   :  { %20 = vsyncpa [#allocation4], 0 }
   0x6   :  { %21 = vsyncpa [#allocation18], 0  ;;  %s39_s11 = sshll.u32 %s1353_s1, 4  ;;  %s1207_s12 = smov [#allocation5]   ;;  %s40_s11 = int_to_ptr.hbm [resolvable:$true] %s39_s11 }
   0x7   :  { %s41_s13 = sshll.u32 %s1207_s12, 4  ;;  %s65_s16 = sshll.u32 %s1355_s3, 4  ;;  %s42_s13 = int_to_ptr.vmem [resolvable:$true] %s41_s13  ;;  %s66_s16 = int_to_ptr.hbm [resolvable:$true] %s65_s16 }
   0x8   :  { %s1208_s17 = smov 64   ;;  %s1209_s18 = smov 4  }
   0x9   :  { %47 = dma.hbm_to_vmem [thread:$0]  %s40_s11, 128, %s42_s13, [#allocation6], %s1208_s17, %s1208_s17, %s1209_s18  }
   0xa   :  { %s1210_s19 = smov [#allocation8]   ;;  %s91_s1 = sshll.u32 %s1357_s5, 4  ;;  %s92_s1 = int_to_ptr.hbm [resolvable:$true] %s91_s1 }
   0xb   :  { %s67_s20 = sshll.u32 %s1210_s19, 4  ;;  %s26_s24 = sshll.u32 %s1352_s0, 4  ;;  %s68_s20 = int_to_ptr.vmem [resolvable:$true] %s67_s20  ;;  %s27_s24 = int_to_ptr.hbm [resolvable:$true] %s26_s24 }
   0xc   :  { %73 = dma.hbm_to_vmem [thread:$0]  %s66_s16, 256, %s68_s20, [#allocation9], %s1208_s17, %s1208_s17, %s1209_s18  }
   0xd   :  { %s1211_s25 = smov [#allocation11]   ;;  %s1212_s27 = smov [#allocation2]  }
   0xe   :  { %s93_s26 = sshll.u32 %s1211_s25, 4  ;;  %s28_s5 = sshll.u32 %s1212_s27, 4  ;;  %s94_s26 = int_to_ptr.vmem [resolvable:$true] %s93_s26  ;;  %s29_s5 = int_to_ptr.vmem [resolvable:$true] %s28_s5 }
   0xf   :  { %99 = dma.hbm_to_vmem [thread:$0]  %s92_s1, 1024, %s94_s26, [#allocation12], %s1208_s17, %s1208_s17, %s1209_s18  }
  0x10   :  { %s52_s30 = sshll.u32 %s1354_s2, 4  ;;  %s78_s11 = sshll.u32 %s1356_s4, 4  ;;  %s53_s30 = int_to_ptr.hbm [resolvable:$true] %s52_s30  ;;  %s79_s11 = int_to_ptr.hbm [resolvable:$true] %s78_s11 }
  0x11   :  { %34 = dma.hbm_to_vmem [thread:$0]  %s27_s24, 128, %s29_s5, [#allocation3], %s1208_s17, %s1208_s17, %s1209_s18  }
  0x12   :  { %s1213_s12 = smov [#allocation7]   ;;  %s1214_s14 = smov [#allocation10]  }
  0x13   :  { %s54_s13 = sshll.u32 %s1213_s12, 4  ;;  %s80_s2 = sshll.u32 %s1214_s14, 4  ;;  %s55_s13 = int_to_ptr.vmem [resolvable:$true] %s54_s13  ;;  %s81_s2 = int_to_ptr.vmem [resolvable:$true] %s80_s2 }
  0x14   :  { %60 = dma.hbm_to_vmem [thread:$0]  %s53_s30, 256, %s55_s13, [#allocation6], %s1208_s17, %s1208_s17, %s1209_s18  }
  0x15   :  { %s104_s19 = sshll.u32 %s1358_s6, 4  ;;  %s118_s21 = sshll.u32 %s1359_s7, 4  ;;  %s105_s19 = int_to_ptr.hbm [resolvable:$true] %s104_s19  ;;  %s119_s21 = int_to_ptr.hbm [resolvable:$true] %s118_s21 }
  0x16   :  { %86 = dma.hbm_to_vmem [thread:$0]  %s79_s11, 1024, %s81_s2, [#allocation9], %s1208_s17, %s1208_s17, %s1209_s18  }
  0x17   :  { %s1215_s22 = smov [#allocation13]   ;;  %s1216_s3 = smov [#allocation14]  }
  0x18   :  { %s106_s1 = sshll.u32 %s1215_s22, 4  ;;  %s120_s6 = sshll.u32 %s1216_s3, 4  ;;  %s107_s1 = int_to_ptr.vmem [resolvable:$true] %s106_s1  ;;  %s121_s6 = int_to_ptr.vmem [resolvable:$true] %s120_s6 }
  0x19   :  { %112 = dma.hbm_to_vmem [thread:$0]  %s105_s19, 1024, %s107_s1, [#allocation12], %s1208_s17, %s1208_s17, %s1209_s18  }
  0x1a   :  { %123 = dma.hbm_to_vmem [thread:$0]  %s119_s21, 160, %s121_s6, [#allocation15]  }
  0x1b   :  { %1193 = dma.done.wait [#allocation3], 128  }
  0x1c   :  { %1194 = vsyncadd [#allocation3], 4294967168 }
  0x1d   :  { %1195 = dma.done.wait [#allocation6], 384  }
  0x1e   :  { %1196 = vsyncadd [#allocation6], 4294966912 }
  0x1f   :  { %1197 = dma.done.wait [#allocation9], 1280  }
  0x20   :  { %1198 = vsyncadd [#allocation9], 4294966016 }
  0x21   :  { %1199 = dma.done.wait [#allocation12], 2048  }
  0x22   :  { %1200 = vsyncadd [#allocation12], 4294965248 }
  0x23   :  { %1201 = dma.done.wait [#allocation15], 160  }
  0x24   :  { %1202 = vsyncadd [#allocation15], 4294967136  ;;  %v869_v0 = vld [vmem:[#allocation8 + $0x8] sm:$0xff]  ;;  %v868_v1 = vld [vmem:[#allocation8] sm:$0xff]  ;;  %vm196_vm0 = vcmask 261120   ;;  %v1217_v17 = vmov 64.0  }
  0x25   :  { %v866_v2 = vld [vmem:[#allocation7 + $0x8] sm:$0xff]  ;;  %206 = vmatpush.bf16.msra.mxu1 %v869_v0  ;;  %v867_v3 = vld [vmem:[#allocation5] sm:$0xff]  ;;  %v865_v4 = vld [vmem:[#allocation7] sm:$0xff]  ;;  %933 = vrcp.f32 %v1217_v17  ;;  %s1220_s7 = smov [#allocation16]   ;;  %s705_s26 = sshll.u32 %s1360_s8, 4  ;;  %s706_s26 = int_to_ptr.hbm [resolvable:$true] %s705_s26 }
  0x26   :  { %v864_v5 = vld [vmem:[#allocation2] sm:$0xff]  ;;  %v923_v8 = vld [vmem:[#allocation14] ss:$0 sm:$0xff]  ;;  %v877_v20 = vld [vmem:[#allocation10 + $0x38] sm:$0xff]  ;;  %s703_s23 = sshll.u32 %s1220_s7, 4  ;;  %s1221_s27 = smov 128   ;;  %s704_s23 = int_to_ptr.vmem [resolvable:$true] %s703_s23 }
  0x27   :  { %386 = vmatpush.bf16.msra.mxu2 %v877_v20  ;;  %v876_v22 = vld [vmem:[#allocation10 + $0x30] sm:$0xff]  ;;  %v875_v24 = vld [vmem:[#allocation10 + $0x28] sm:$0xff]  ;;  %v874_v26 = vld [vmem:[#allocation10 + $0x20] sm:$0xff]  ;;  %s1222_s5 = smov 8   ;;  %s1223_s8 = smov [#allocation17]  }
  0x28   :  { %v873_v28 = vld [vmem:[#allocation10 + $0x18] sm:$0xff]  ;;  %v872_v34 = vld [vmem:[#allocation10 + $0x10] sm:$0xff]  ;;  %v871_v36 = vld [vmem:[#allocation10 + $0x8] sm:$0xff]  ;;  %s716_s28 = sshll.u32 %s1223_s8, 4  ;;  %s718_s0 = sshll.u32 %s1361_s9, 4  ;;  %s717_s28 = int_to_ptr.vmem [resolvable:$true] %s716_s28  ;;  %s719_s0 = int_to_ptr.hbm [resolvable:$true] %s718_s0 }
  0x29   :  { %207 = vmatpush.bf16.msra.mxu1 %v868_v1  ;;  %v870_v41 = vld [vmem:[#allocation10] sm:$0xff] }
  0x2a   :  { %v924_v61 = vld [vmem:[#allocation14 + $0x1] ss:$0 sm:$0xff] }
  0x2b   :  { %v934_v18 = vpop.eup %933  ;;  %387 = vmatpush.bf16.msra.mxu2 %v876_v22 }
  0x2c   :  { %752 = vmatmul.msk.bf16.vlgmr.msra.gmra.mxu1 %vm196_vm0, %v867_v3  ;;  %v264_v19 = vmul.f32 64.0, %v934_v18  ;;  %vm268_vm1 = vweird.f32 %v934_v18 }
  0x2d   :  { %240 = vmatpush.bf16.msrb.mxu1 %v866_v2  ;;  %v925_v2 = vld [vmem:[#allocation14 + $0x2] ss:$0 sm:$0xff] }
  0x2e   :  { %v265_v21 = vsub.f32 1.0, %v264_v19 }
  0x2f   :  { %388 = vmatpush.bf16.msra.mxu2 %v875_v24 }
  0x30   :  { %v266_v23 = vmul.f32 %v934_v18, %v265_v21  ;;  %v885_v21 = vld [vmem:[#allocation11 + $0x38] sm:$0xff] }
  0x31   :  { %241 = vmatpush.bf16.msrb.mxu1 %v865_v4  ;;  %533 = vmatpush.bf16.msra.mxu3 %v885_v21  ;;  %v929_v21 = vld [vmem:[#allocation14 + $0x6] ss:$0 sm:$0xff] }
  0x32   :  { %v267_v25 = vadd.f32 %v934_v18, %v266_v23  ;;  %v884_v23 = vld [vmem:[#allocation11 + $0x30] sm:$0xff] }
  0x33   :  { %389 = vmatpush.bf16.msra.mxu2 %v874_v26 }
  0x34   :  { %v269_v27 = vsel %vm268_vm1, %v934_v18, %v267_v25  ;;  %v1218_v18 = vmov 32.0   ;;  %v883_v25 = vld [vmem:[#allocation11 + $0x28] sm:$0xff] }
  0x35   :  { %534 = vmatpush.bf16.msra.mxu3 %v884_v23 }
  0x37   :  { %390 = vmatpush.bf16.msra.mxu2 %v873_v28 }
  0x39   :  { %535 = vmatpush.bf16.msra.mxu3 %v883_v25 }
  0x3b   :  { %391 = vmatpush.bf16.msra.mxu2 %v872_v34 }
  0x3c   :  { %765 = vmatmul.msk.bf16.vlgmr.msrb.gmra.mxu1 %vm196_vm0, %v864_v5 }
  0x3f   :  { %392 = vmatpush.bf16.msra.mxu2 %v871_v36 }
  0x43   :  { %393 = vmatpush.bf16.msra.mxu2 %v870_v41 }
  0xa9   :  { %v209_v6 = vpop.f32.mrf.mxu1 }
  0xb1   :  { %v211_v7 = vpop.f32.mrf.mxu1 }
  0xb9   :  { %v243_v9 = vpop.f32.mrf.mxu1 }
  0xba   :  { %v244_v10 = vadd.f32 %v243_v9, %v209_v6 }
  0xbc   :  { %v1319_v11 = vadd.f32 %v923_v8, %v244_v10 }
  0xbe   :  { %253 = vadd.xlane.f32.xlu0 %v1319_v11  ;;  %v257_v12 = vmul.f32 %v1319_v11, %v1319_v11 }
  0xc0   :  { %259 = vadd.xlane.f32.xlu1 %v257_v12 }
  0xc1   :  { %v245_v13 = vpop.f32.mrf.mxu1 }
  0xc2   :  { %v246_v14 = vadd.f32 %v245_v13, %v211_v7 }
  0xc4   :  { %v1324_v15 = vadd.f32 %v923_v8, %v246_v14 }
  0xc6   :  { %255 = vadd.xlane.f32.xlu0 %v1324_v15  ;;  %v258_v16 = vmul.f32 %v1324_v15, %v1324_v15 }
  0xc8   :  { %261 = vadd.xlane.f32.xlu1 %v258_v16 }
 0x131   :  { %v254_v29 = vpop.xlane.xlu0 %253 }
 0x132   :  { %v270_v30 = vmul.f32 %v269_v27, %v254_v29  ;;  %v881_v29 = vld [vmem:[#allocation11 + $0x18] sm:$0xff] }
 0x133   :  { %v260_v31 = vpop.xlane.xlu1 %259 }
 0x134   :  { %v274_v32 = vmul.f32 %v270_v30, %v270_v30  ;;  %v272_v33 = vmul.f32 %v269_v27, %v260_v31  ;;  %v280_v58 = vsub.f32 %v1319_v11, %v270_v30  ;;  %v926_v11 = vld [vmem:[#allocation14 + $0x3] ss:$0 sm:$0xff] }
 0x136   :  { %v276_v35 = vsub.f32 %v272_v33, %v274_v32 }
 0x138   :  { %v278_v37 = vmax.f32 %v276_v35, 0.0  ;;  %v880_v35 = vld [vmem:[#allocation11 + $0x10] sm:$0xff] }
 0x139   :  { %v256_v38 = vpop.xlane.xlu0 %255 }
 0x13a   :  { %v282_v39 = vadd.f32 1e-05, %v278_v37  ;;  %v271_v40 = vmul.f32 %v269_v27, %v256_v38  ;;  %v879_v37 = vld [vmem:[#allocation11 + $0x8] sm:$0xff] }
 0x13b   :  { %v262_v42 = vpop.xlane.xlu1 %261 }
 0x13c   :  { %935 = vrsqrt.f32 %v282_v39  ;;  %v275_v43 = vmul.f32 %v271_v40, %v271_v40  ;;  %v273_v44 = vmul.f32 %v269_v27, %v262_v42  ;;  %vm290_vm3 = vweird.f32 %v282_v39  ;;  %v882_v27 = vld [vmem:[#allocation11 + $0x20] sm:$0xff] }
 0x13d   :  { %v281_v0 = vsub.f32 %v1324_v15, %v271_v40  ;;  %536 = vmatpush.bf16.msra.mxu3 %v882_v27  ;;  %v878_v42 = vld [vmem:[#allocation11] sm:$0xff] }
 0x13e   :  { %v277_v45 = vsub.f32 %v273_v44, %v275_v43 }
 0x140   :  { %v279_v46 = vmax.f32 %v277_v45, 0.0 }
 0x141   :  { %537 = vmatpush.bf16.msra.mxu3 %v881_v29  ;;  %v931_v29 = vld [vmem:[#allocation14 + $0x8] ss:$0 sm:$0xff] }
 0x142   :  { %v936_v47 = vpop.eup %935  ;;  %v283_v49 = vadd.f32 1e-05, %v279_v46 }
 0x143   :  { %v285_v48 = vmul.f32 %v936_v47, %v282_v39  ;;  %vm291_vm2 = vweird.f32 %v936_v47 }
 0x144   :  { %937 = vrsqrt.f32 %v283_v49  ;;  %vm292_vm4 = vmor %vm290_vm3, %vm291_vm2  ;;  %vm300_vm6 = vweird.f32 %v283_v49 }
 0x145   :  { %v286_v50 = vmul.f32 %v936_v47, %v285_v48  ;;  %939 = vrcp.f32 %v1218_v18  ;;  %538 = vmatpush.bf16.msra.mxu3 %v880_v35  ;;  %v893_v48 = vld [vmem:[#allocation13 + $0x38] sm:$0xff]  ;;  %v888_v18 = vld [vmem:[#allocation13 + $0x10] sm:$0xff] }
 0x146   :  { %617 = vmatpush.bf16.msra.mxu0 %v893_v48 }
 0x147   :  { %v287_v51 = vmul.f32 0.5, %v286_v50 }
 0x149   :  { %v288_v52 = vsub.f32 1.5, %v287_v51  ;;  %539 = vmatpush.bf16.msra.mxu3 %v879_v37  ;;  %v1219_v37 = vmov 0  }
 0x14a   :  { %v938_v53 = vpop.eup %937  ;;  %916 = vset.pattern.permute.xlu1 %v1219_v37  ;;  %922 = vset.pattern.permute.xlu0 %v1219_v37 }
 0x14b   :  { %v289_v54 = vmul.f32 %v936_v47, %v288_v52  ;;  %v295_v55 = vmul.f32 %v938_v53, %v283_v49  ;;  %vm301_vm5 = vweird.f32 %v938_v53  ;;  %v940_v19 = vpop.eup %939  ;;  %v892_v52 = vld [vmem:[#allocation13 + $0x30] sm:$0xff] }
 0x14c   :  { %vm302_vm7 = vmor %vm300_vm6, %vm301_vm5  ;;  %v411_v20 = vmul.f32 32.0, %v940_v19  ;;  %vm415_vm8 = vweird.f32 %v940_v19  ;;  %618 = vmatpush.bf16.msra.mxu0 %v892_v52 }
 0x14d   :  { %v296_v56 = vmul.f32 %v938_v53, %v295_v55  ;;  %v293_v57 = vsel %vm292_vm4, %v936_v47, %v289_v54  ;;  %540 = vmatpush.bf16.msra.mxu3 %v878_v42  ;;  %v891_v55 = vld [vmem:[#allocation13 + $0x28] sm:$0xff] }
 0x14e   :  { %v304_v60 = vmul.f32 %v293_v57, %v280_v58  ;;  %v412_v22 = vsub.f32 1.0, %v411_v20  ;;  %v886_v20 = vld [vmem:[#allocation13] sm:$0xff] }
 0x14f   :  { %v297_v59 = vmul.f32 0.5, %v296_v56 }
 0x150   :  { %v309_v1 = vmul.f32 %v924_v61, %v304_v60  ;;  %v413_v24 = vmul.f32 %v940_v19, %v412_v22  ;;  %619 = vmatpush.bf16.msra.mxu0 %v891_v55 }
 0x151   :  { %v298_v62 = vsub.f32 1.5, %v297_v59  ;;  %v890_v59 = vld [vmem:[#allocation13 + $0x20] sm:$0xff] }
 0x152   :  { %v314_v6 = vadd.f32 %v925_v2, %v309_v1  ;;  %v414_v26 = vadd.f32 %v940_v19, %v413_v24 }
 0x153   :  { %v299_v63 = vmul.f32 %v938_v53, %v298_v62 }
 0x154   :  { %v316_v8 = vmax.f32 %v314_v6, 0.0  ;;  %v416_v28 = vsel %vm415_vm8, %v940_v19, %v414_v26  ;;  %620 = vmatpush.bf16.msra.mxu0 %v890_v59  ;;  %v887_v19 = vld [vmem:[#allocation13 + $0x8] sm:$0xff]  ;;  %v930_v26 = vld [vmem:[#allocation14 + $0x7] ss:$0 sm:$0xff] }
 0x155   :  { %v303_v3 = vsel %vm302_vm7, %v938_v53, %v299_v63 }
 0x156   :  { %v305_v4 = vmul.f32 %v303_v3, %v281_v0  ;;  %v889_v0 = vld [vmem:[#allocation13 + $0x18] sm:$0xff]  ;;  %v927_v3 = vld [vmem:[#allocation14 + $0x4] ss:$0 sm:$0xff] }
 0x158   :  { %v310_v5 = vmul.f32 %v924_v61, %v305_v4  ;;  %621 = vmatpush.bf16.msra.mxu0 %v889_v0 }
 0x15a   :  { %v315_v7 = vadd.f32 %v925_v2, %v310_v5 }
 0x15c   :  { %v317_v9 = vmax.f32 %v315_v7, 0.0  ;;  %622 = vmatpush.bf16.msra.mxu0 %v888_v18 }
 0x15e   :  { %v318_v10 = vpack.c.bf16 %v317_v9, %v316_v8  ;;  %v928_v8 = vld [vmem:[#allocation14 + $0x5] ss:$0 sm:$0xff] }
 0x160   :  { %394 = vmatmul.bf16.vlgmr.msra.gmra.mxu2 %v318_v10  ;;  %623 = vmatpush.bf16.msra.mxu0 %v887_v19 }
 0x164   :  { %624 = vmatpush.bf16.msra.mxu0 %v886_v20 }
 0x1e3   :  { %v395_v12 = vpop.f32.mrf.mxu2 }
 0x1e4   :  { %v1331_v13 = vadd.f32 %v926_v11, %v395_v12 }
 0x1e6   :  { %400 = vadd.xlane.f32.xlu2 %v1331_v13  ;;  %v404_v14 = vmul.f32 %v1331_v13, %v1331_v13 }
 0x1e8   :  { %406 = vadd.xlane.f32.xlu0 %v404_v14 }
 0x1eb   :  { %v397_v15 = vpop.f32.mrf.mxu2 }
 0x1ec   :  { %v1336_v16 = vadd.f32 %v926_v11, %v397_v15 }
 0x1ee   :  { %402 = vadd.xlane.f32.xlu2 %v1336_v16  ;;  %v405_v17 = vmul.f32 %v1336_v16, %v1336_v16 }
 0x1f0   :  { %408 = vadd.xlane.f32.xlu1 %v405_v17 }
 0x259   :  { %v401_v30 = vpop.xlane.xlu2 %400 }
 0x25a   :  { %v417_v31 = vmul.f32 %v416_v28, %v401_v30 }
 0x25b   :  { %v407_v32 = vpop.xlane.xlu0 %406 }
 0x25c   :  { %v421_v33 = vmul.f32 %v417_v31, %v417_v31  ;;  %v419_v34 = vmul.f32 %v416_v28, %v407_v32  ;;  %v427_v63 = vsub.f32 %v1331_v13, %v417_v31 }
 0x25e   :  { %v423_v36 = vsub.f32 %v419_v34, %v421_v33 }
 0x260   :  { %v425_v38 = vmax.f32 %v423_v36, 0.0  ;;  %v932_v36 = vld [vmem:[#allocation14 + $0x9] ss:$0 sm:$0xff] }
 0x261   :  { %v403_v39 = vpop.xlane.xlu2 %402 }
 0x262   :  { %v429_v40 = vadd.f32 1e-05, %v425_v38  ;;  %v418_v41 = vmul.f32 %v416_v28, %v403_v39 }
 0x263   :  { %v409_v43 = vpop.xlane.xlu1 %408 }
 0x264   :  { %941 = vrsqrt.f32 %v429_v40  ;;  %v422_v44 = vmul.f32 %v418_v41, %v418_v41  ;;  %v420_v45 = vmul.f32 %v416_v28, %v409_v43  ;;  %vm437_vm10 = vweird.f32 %v429_v40 }
 0x265   :  { %v428_v6 = vsub.f32 %v1336_v16, %v418_v41 }
 0x266   :  { %v424_v46 = vsub.f32 %v420_v45, %v422_v44 }
 0x268   :  { %v426_v47 = vmax.f32 %v424_v46, 0.0 }
 0x26a   :  { %v942_v49 = vpop.eup %941  ;;  %v430_v51 = vadd.f32 1e-05, %v426_v47 }
 0x26b   :  { %v432_v50 = vmul.f32 %v942_v49, %v429_v40  ;;  %vm438_vm9 = vweird.f32 %v942_v49 }
 0x26c   :  { %943 = vrsqrt.f32 %v430_v51  ;;  %vm439_vm11 = vmor %vm437_vm10, %vm438_vm9  ;;  %vm447_vm13 = vweird.f32 %v430_v51 }
 0x26d   :  { %v433_v53 = vmul.f32 %v942_v49, %v432_v50 }
 0x26f   :  { %v434_v54 = vmul.f32 0.5, %v433_v53 }
 0x271   :  { %v435_v56 = vsub.f32 1.5, %v434_v54 }
 0x272   :  { %v944_v57 = vpop.eup %943 }
 0x273   :  { %v436_v58 = vmul.f32 %v942_v49, %v435_v56  ;;  %v442_v60 = vmul.f32 %v944_v57, %v430_v51  ;;  %vm448_vm12 = vweird.f32 %v944_v57 }
 0x274   :  { %vm449_vm14 = vmor %vm447_vm13, %vm448_vm12 }
 0x275   :  { %v443_v61 = vmul.f32 %v944_v57, %v442_v60  ;;  %v440_v62 = vsel %vm439_vm11, %v942_v49, %v436_v58 }
 0x276   :  { %v451_v2 = vmul.f32 %v440_v62, %v427_v63 }
 0x277   :  { %v444_v1 = vmul.f32 0.5, %v443_v61 }
 0x278   :  { %v456_v7 = vmul.f32 %v927_v3, %v451_v2 }
 0x279   :  { %v445_v4 = vsub.f32 1.5, %v444_v1 }
 0x27a   :  { %v461_v12 = vadd.f32 %v928_v8, %v456_v7 }
 0x27b   :  { %v446_v5 = vmul.f32 %v944_v57, %v445_v4 }
 0x27c   :  { %v463_v14 = vmax.f32 %v461_v12, 0.0 }
 0x27d   :  { %v450_v9 = vsel %vm449_vm14, %v944_v57, %v446_v5 }
 0x27e   :  { %v452_v10 = vmul.f32 %v450_v9, %v428_v6 }
 0x280   :  { %v457_v11 = vmul.f32 %v927_v3, %v452_v10 }
 0x282   :  { %v462_v13 = vadd.f32 %v928_v8, %v457_v11 }
 0x284   :  { %v464_v15 = vmax.f32 %v462_v13, 0.0 }
 0x286   :  { %v465_v17 = vpack.c.bf16 %v464_v15, %v463_v14 }
 0x288   :  { %541 = vmatmul.bf16.vlgmr.msra.gmra.mxu3 %v465_v17 }
 0x30b   :  { %v542_v16 = vpop.f32.mrf.mxu3 }
 0x30c   :  { %v543_v22 = vadd.f32 %v929_v21, %v542_v16 }
 0x30e   :  { %547 = vst [vmem:[#allocation16] sm:$0xff] %v543_v22 }
 0x313   :  { %v544_v23 = vpop.f32.mrf.mxu3 }
 0x314   :  { %v545_v24 = vadd.f32 %v929_v21, %v544_v23 }
 0x316   :  { %548 = vst [vmem:[#allocation16 + $0x8] sm:$0xff] %v545_v24  ;;  %v549_v25 = vpack.c.bf16 %v545_v24, %v543_v22 }
 0x317   :  { %711 = dma.vmem_to_hbm [thread:$0]  %s704_s23, 256, %s706_s26, [#allocation4], %s1221_s27, %s1221_s27, %s1222_s5  }
 0x318   :  { %625 = vmatmul.bf16.vlgmr.msra.gmra.mxu0 %v549_v25 }
 0x395   :  { %v626_v27 = vpop.f32.mrf.mxu0 }
 0x396   :  { %v627_v28 = vadd.f32 %v930_v26, %v626_v27 }
 0x398   :  { %v631_v30 = vmax.f32 %v627_v28, 0.0 }
 0x39a   :  { %v636_v31 = vmul.f32 %v931_v29, %v631_v30 }
 0x39c   :  { %638 = vadd.xlane.f32.xlu2 %v636_v31 }
 0x39d   :  { %v628_v32 = vpop.f32.mrf.mxu0 }
 0x39e   :  { %v629_v33 = vadd.f32 %v930_v26, %v628_v32 }
 0x3a0   :  { %v632_v34 = vmax.f32 %v629_v33, 0.0 }
 0x3a2   :  { %v637_v35 = vmul.f32 %v931_v29, %v632_v34 }
 0x3a4   :  { %640 = vadd.xlane.f32.xlu0 %v637_v35 }
 0x40f   :  { %v639_v38 = vpop.xlane.xlu2 %638 }
 0x410   :  { %v645_v39 = vadd.f32 %v932_v36, %v639_v38 }
 0x412   :  { %v862_v40 = vmul.f32 -1.442695, %v645_v39 }
 0x414   :  { %945 = vpow2.f32 %v862_v40 }
 0x417   :  { %v641_v41 = vpop.xlane.xlu0 %640 }
 0x418   :  { %v646_v42 = vadd.f32 %v932_v36, %v641_v41 }
 0x41a   :  { %v946_v43 = vpop.eup %945  ;;  %v863_v44 = vmul.f32 -1.442695, %v646_v42 }
 0x41b   :  { %v653_v45 = vadd.f32 1.0, %v946_v43 }
 0x41c   :  { %947 = vpow2.f32 %v863_v44 }
 0x41d   :  { %949 = vrcp.f32 %v653_v45  ;;  %vm660_vm0 = vweird.f32 %v653_v45  ;;  %v666_v56 = vand.u32 2147483648, %v653_v45  ;;  %v664_v58 = vand.u32 2147483647, %v653_v45 }
 0x41f   :  { %v667_v63 = vor.u32 1.1754944e-38, %v666_v56  ;;  %vm665_vm5 = vcmp.eq.f32.partialorder %v664_v58, 8.507059e+37 }
 0x422   :  { %v948_v46 = vpop.eup %947 }
 0x423   :  { %v950_v47 = vpop.eup %949  ;;  %v654_v48 = vadd.f32 1.0, %v948_v46 }
 0x424   :  { %v656_v49 = vmul.f32 %v950_v47, %v653_v45  ;;  %vm661_vm15 = vweird.f32 %v950_v47 }
 0x425   :  { %951 = vrcp.f32 %v654_v48  ;;  %v681_v57 = vand.u32 2147483648, %v654_v48  ;;  %v679_v60 = vand.u32 2147483647, %v654_v48  ;;  %vm662_vm2 = vmor %vm660_vm0, %vm661_vm15  ;;  %vm675_vm3 = vweird.f32 %v654_v48 }
 0x426   :  { %v657_v50 = vsub.f32 1.0, %v656_v49 }
 0x427   :  { %v682_v0 = vor.u32 1.1754944e-38, %v681_v57  ;;  %vm680_vm6 = vcmp.eq.f32.partialorder %v679_v60, 8.507059e+37 }
 0x428   :  { %v658_v51 = vmul.f32 %v950_v47, %v657_v50 }
 0x42a   :  { %v659_v54 = vadd.f32 %v950_v47, %v658_v51 }
 0x42b   :  { %v952_v52 = vpop.eup %951 }
 0x42c   :  { %v671_v53 = vmul.f32 %v952_v52, %v654_v48  ;;  %vm676_vm1 = vweird.f32 %v952_v52  ;;  %v663_v61 = vsel %vm662_vm2, %v950_v47, %v659_v54 }
 0x42d   :  { %vm677_vm4 = vmor %vm675_vm3, %vm676_vm1  ;;  %v668_v2 = vsel %vm665_vm5, %v667_v63, %v663_v61 }
 0x42e   :  { %v672_v55 = vsub.f32 1.0, %v671_v53 }
 0x430   :  { %v673_v59 = vmul.f32 %v952_v52, %v672_v55 }
 0x432   :  { %v674_v62 = vadd.f32 %v952_v52, %v673_v59 }
 0x434   :  { %v678_v1 = vsel %vm677_vm4, %v952_v52, %v674_v62 }
 0x435   :  { %v683_v3 = vsel %vm680_vm6, %v682_v0, %v678_v1 }
 0x436   :  { %v917_v4 = vpack.i.bf16 %v683_v3, %v668_v2 }
 0x438   :  { %918 = vperm.xlu1 %916, %v917_v4  }
 0x4aa   :  { %v919_v5 = vpop.permute.xlu1 %918 }
 0x4ab   :  { %v921_v6 = vunpack.i.h.bf16 %v919_v5  ;;  %v920_v7 = vunpack.i.l.bf16 %v919_v5 }
 0x4ad   :  { %v897_v8 = vpack.c.bf16 %v921_v6, %v920_v7 }
 0x4af   :  { %898 = vst [vmem:[#allocation17] sm:$0xff] %v897_v8  }
 0x4b0   :  { %724 = dma.vmem_to_hbm [thread:$0]  %s717_s28, 128, %s719_s0, [#allocation18], %s1208_s17, %s1208_s17, %s1209_s18  }
 0x4b1   :  { %1203 = dma.done.wait [#allocation4], 256  }
 0x4b2   :  { %1204 = vsyncadd [#allocation4], 4294967040 }
 0x4b3   :  { %1205 = dma.done.wait [#allocation18], 128  }
 0x4b4   :  { %1206 = vsyncadd [#allocation18], 4294967168 }
 0x4b5   :  { %733 = vsyncpa [#allocation3], 1 }
 0x4b6   :  { %734 = vsyncpa [#allocation6], 1 }
 0x4b7   :  { %735 = vsyncpa [#allocation9], 1 }
 0x4b8   :  { %736 = vsyncpa [#allocation12], 1 }
 0x4b9   :  { %737 = vsyncpa [#allocation15], 1 }
 0x4ba   :  { %738 = vsyncpa [#allocation4], 1 }
 0x4bb   :  { %739 = vsyncpa [#allocation18], 1 }

</bundles_post_ra>
